<compile_context>
chip_gen: v6e
topology: v6e:2x2x1
jax: 0.10.0
libtpu: 0.0.40
codegen_flags: <defaults>
</compile_context>

<pallas_src>
import jax
import jax.numpy as jnp
from jax import lax
from jax.experimental import pallas as pl
from jax.experimental.pallas import tpu as pltpu


def _ce_loss_kernel(n_ref, x_ref, w_ref, b_ref, t_ref, out_ref,
                    m_ref, l_ref, tgt_ref):
    i = pl.program_id(0)          # token-tile index (parallel)
    v = pl.program_id(1)          # vocab-tile index (reduction axis)
    num_v = pl.num_programs(1)

    @pl.when(v == 0)
    def _():
        m_ref[...] = jnp.full_like(m_ref, -jnp.inf)
        l_ref[...] = jnp.zeros_like(l_ref)
        tgt_ref[...] = jnp.zeros_like(tgt_ref)

    # (TM, TV) logits tile: bf16 operands on the MXU, f32 accumulation.
    logits = jnp.dot(x_ref[...], w_ref[...], preferred_element_type=jnp.float32)
    logits = logits + b_ref[...]                       # broadcast (1, TV)

    tm, tv = logits.shape

    # online (streaming) logsumexp update
    m_prev = m_ref[...]                                           # (TM, 1)
    m_new = jnp.maximum(m_prev, jnp.max(logits, axis=-1, keepdims=True))
    alpha = jnp.exp(m_prev - m_new)                               # rescale old sum
    l_ref[...] = alpha * l_ref[...] + jnp.sum(jnp.exp(logits - m_new),
                                              axis=-1, keepdims=True)
    m_ref[...] = m_new

    # gather this vocab tile's contribution to the target logit (accumulated
    # in linear space, so no running-max rescale is needed here)
    cols = lax.broadcasted_iota(jnp.int32, logits.shape, 1) + v * tv
    tgt_mask = cols == t_ref[...]                                 # (TM, TV)
    tgt_ref[...] += jnp.sum(jnp.where(tgt_mask, logits, 0.0),
                            axis=-1, keepdims=True)

    @pl.when(v == num_v - 1)
    def _():
        per_token = m_ref[...] + jnp.log(l_ref[...]) - tgt_ref[...]   # (TM, 1)
        # mask out padded tail rows against the GLOBAL token count
        rows = lax.broadcasted_iota(jnp.int32, per_token.shape, 0) + i * tm
        valid = rows < n_ref[0]
        partial = jnp.sum(jnp.where(valid, per_token, 0.0))
        lane = lax.broadcasted_iota(jnp.int32, (1, 128), 1)
        out_ref[...] = jnp.where(lane == 0, partial, 0.0)


def _round_up(a, b):
    return (a + b - 1) // b * b


def ce_loss(x, w_t, b, target, *, tm=None, tv=None):
    """x: (N, E), w_t: (E, V), b: (V,), target: (N,) int -> scalar f32 loss."""
    N, E = x.shape
    V = w_t.shape[1]

    # Tile sizes: multiples of (8, 128); the defaults also cover tiny test
    # shapes without excess padding.
    # TODO(synk): for production vocab sizes, raise TM to 256 (v6e/v7x MXU is
    # 2x256^2) and TV to 1024+ and re-derive per-generation VMEM budgets.
    if tm is None:
        tm = min(256, _round_up(N, 8))
    if tv is None:
        tv = min(1024, _round_up(V, 128))

    n_pad = _round_up(N, tm)
    v_pad = _round_up(V, tv)
    num_tm = n_pad // tm
    num_tv = v_pad // tv

    # bf16 matmul operands; everything else f32.  Padded vocab columns get a
    # very negative bias so their exp() underflows to zero and they can never
    # match a valid target index.
    x_p = jnp.pad(x.astype(jnp.float32), ((0, n_pad - N), (0, 0))).astype(jnp.bfloat16)
    w_p = jnp.pad(w_t.astype(jnp.float32), ((0, 0), (0, v_pad - V))).astype(jnp.bfloat16)
    b_p = jnp.pad(b.astype(jnp.float32), (0, v_pad - V),
                  constant_values=-1e30).reshape(1, v_pad)
    t_p = jnp.pad(target.astype(jnp.int32), (0, n_pad - N)).reshape(n_pad, 1)
    n_arr = jnp.array([N], jnp.int32)   # scalar-prefetch: global token count

    grid_spec = pltpu.PrefetchScalarGridSpec(
        num_scalar_prefetch=1,
        grid=(num_tm, num_tv),
        in_specs=[
            pl.BlockSpec((tm, E), lambda i, v, n: (i, 0)),    # x tile
            pl.BlockSpec((E, tv), lambda i, v, n: (0, v)),    # W tile (streamed)
            pl.BlockSpec((1, tv), lambda i, v, n: (0, v)),    # bias tile
            pl.BlockSpec((tm, 1), lambda i, v, n: (i, 0)),    # targets
        ],
        out_specs=pl.BlockSpec((1, 128), lambda i, v, n: (i, 0)),
        scratch_shapes=[
            pltpu.VMEM((tm, 1), jnp.float32),   # running max m
            pltpu.VMEM((tm, 1), jnp.float32),   # running sum l
            pltpu.VMEM((tm, 1), jnp.float32),   # running target logit
        ],
    )

    cost = pl.CostEstimate(
        flops=2 * n_pad * E * v_pad + 5 * n_pad * v_pad,
        transcendentals=n_pad * v_pad,
        bytes_accessed=(x_p.size * 2 + w_p.size * 2 + b_p.size * 4
                        + t_p.size * 4 + num_tm * 128 * 4),
    )

    partials = pl.pallas_call(
        _ce_loss_kernel,
        out_shape=jax.ShapeDtypeStruct((num_tm, 128), jnp.float32),
        grid_spec=grid_spec,
        compiler_params=pltpu.CompilerParams(
            dimension_semantics=("parallel", "arbitrary"),
            vmem_limit_bytes=48 * 1024 * 1024,
        ),
        cost_estimate=cost,
    )(n_arr, x_p, w_p, b_p, t_p)

    # mean reduction over the GLOBAL token count (CrossEntropyLoss default;
    # CELoss size_average=True)
    return jnp.sum(partials) / jnp.float32(N)


def _reference_ce_loss(x, w_t, b, target):
    logits = x.astype(jnp.float32) @ w_t.astype(jnp.float32) + b[None, :].astype(jnp.float32)
    lse = jax.nn.logsumexp(logits, axis=-1)
    tgt = jnp.take_along_axis(logits, target[:, None], axis=-1)[:, 0]
    return jnp.mean(lse - tgt)


if __name__ == "__main__":
    key = jax.random.PRNGKey(0)

    # ---- case 1: shapes implied by the forward (N tokens, E=nhidden, V=ntokens)
    N, E, V = 8, 32, 128
    kx, kw, kb, kt, key = jax.random.split(key, 5)
    bound = 1.0 / (E ** 0.5)
    weight = jax.random.uniform(kw, (V, E), jnp.float32, -bound, bound)  # nn.Linear weight
    bias = jax.random.uniform(kb, (V,), jnp.float32, -bound, bound)
    w_t = weight.T                                                       # (E, V)
    x = jax.random.normal(kx, (N, E), jnp.float32)
    target = jax.random.randint(kt, (N,), 0, V, jnp.int32)

    loss = ce_loss(x, w_t, bias, target)
    jax.block_until_ready(loss)

    # reference with the same bf16 operand rounding the kernel uses
    xr = x.astype(jnp.bfloat16).astype(jnp.float32)
    wr = w_t.astype(jnp.bfloat16).astype(jnp.float32)
    ref = _reference_ce_loss(xr, wr, bias, target)
    assert jnp.allclose(loss, ref, rtol=1e-4, atol=1e-4), (loss, ref)
    # loose check against full-f32 math (difference is only bf16 operand rounding)
    ref32 = _reference_ce_loss(x, w_t, bias, target)
    assert jnp.allclose(loss, ref32, rtol=5e-2, atol=5e-2), (loss, ref32)

    # ---- case 2: exercise multi-tile vocab streaming + ragged token tail
    N2, E2, V2 = 20, 32, 512
    kx2, kw2, kb2, kt2, key = jax.random.split(key, 5)
    bound2 = 1.0 / (E2 ** 0.5)
    w2 = jax.random.uniform(kw2, (E2, V2), jnp.float32, -bound2, bound2)
    b2 = jax.random.uniform(kb2, (V2,), jnp.float32, -bound2, bound2)
    x2 = jax.random.normal(kx2, (N2, E2), jnp.float32)
    t2 = jax.random.randint(kt2, (N2,), 0, V2, jnp.int32)

    loss2 = ce_loss(x2, w2, b2, t2, tm=8, tv=128)   # grid (3 token tiles, 4 vocab tiles)
    jax.block_until_ready(loss2)
    ref2 = _reference_ce_loss(x2.astype(jnp.bfloat16).astype(jnp.float32),
                              w2.astype(jnp.bfloat16).astype(jnp.float32), b2, t2)
    assert jnp.allclose(loss2, ref2, rtol=1e-4, atol=1e-4), (loss2, ref2)

    print("KERNEL_OK")
</pallas_src>

<mosaic_0001>
module attributes {stable_mosaic.version = 11 : i64} {
  func.func @_ce_loss_kernel(%arg0: i32, %arg1: i32, %arg2: memref<1xi32, #tpu.memory_space<smem>>, %arg3: memref<8x32xbf16, #tpu.memory_space<vmem>>, %arg4: memref<32x128xbf16, #tpu.memory_space<vmem>>, %arg5: memref<1x128xf32, #tpu.memory_space<vmem>>, %arg6: memref<8x1xi32, #tpu.memory_space<vmem>>, %arg7: memref<1x128xf32, #tpu.memory_space<vmem>>, %arg8: memref<8x1xf32, #tpu.memory_space<vmem>>, %arg9: memref<8x1xf32, #tpu.memory_space<vmem>>, %arg10: memref<8x1xf32, #tpu.memory_space<vmem>>) attributes {dimension_semantics = [#tpu.dimension_semantics<parallel>, #tpu.dimension_semantics<arbitrary>], iteration_bounds = array<i64: 1, 1>, scalar_prefetch = 1 : i64, scratch_operands = 3 : i64, tpu.core_type = #tpu.core_type<tc>, window_params = [{transform_indices = @transform_0, window_bounds = array<i64: 8, 32>}, {transform_indices = @transform_1, window_bounds = array<i64: 32, 128>}, {transform_indices = @transform_2, window_bounds = array<i64: 1, 128>}, {transform_indices = @transform_3, window_bounds = array<i64: 8, 1>}, {transform_indices = @transform_4, window_bounds = array<i64: 1, 128>}]} {
    %c0_i32 = arith.constant 0 : i32
    %0 = arith.cmpi eq, %arg1, %c0_i32 : i32
    %1 = arith.extui %0 : i1 to i32
    %c0_i32_0 = arith.constant 0 : i32
    %2 = arith.cmpi ne, %1, %c0_i32_0 : i32
    scf.if %2 {
      %cst_26 = arith.constant 0xFF800000 : f32
      %42 = vector.broadcast %cst_26 : f32 to vector<8x1xf32>
      %c0_27 = arith.constant 0 : index
      %c0_28 = arith.constant 0 : index
      %43 = vector.load %arg8[%c0_27, %c0_28] : memref<8x1xf32, #tpu.memory_space<vmem>>, vector<8x1xf32>
      tpu.vector_store %arg8[%c0_27, %c0_28], %42 {strides = array<i32>} : memref<8x1xf32, #tpu.memory_space<vmem>>, vector<8x1xf32>,
      %cst_29 = arith.constant 0.000000e+00 : f32
      %44 = vector.broadcast %cst_29 : f32 to vector<8x1xf32>
      %c0_30 = arith.constant 0 : index
      %c0_31 = arith.constant 0 : index
      %45 = vector.load %arg9[%c0_30, %c0_31] : memref<8x1xf32, #tpu.memory_space<vmem>>, vector<8x1xf32>
      tpu.vector_store %arg9[%c0_30, %c0_31], %44 {strides = array<i32>} : memref<8x1xf32, #tpu.memory_space<vmem>>, vector<8x1xf32>,
      %cst_32 = arith.constant 0.000000e+00 : f32
      %46 = vector.broadcast %cst_32 : f32 to vector<8x1xf32>
      %c0_33 = arith.constant 0 : index
      %c0_34 = arith.constant 0 : index
      %47 = vector.load %arg10[%c0_33, %c0_34] : memref<8x1xf32, #tpu.memory_space<vmem>>, vector<8x1xf32>
      tpu.vector_store %arg10[%c0_33, %c0_34], %46 {strides = array<i32>} : memref<8x1xf32, #tpu.memory_space<vmem>>, vector<8x1xf32>,
    } else {
    }
    %c0 = arith.constant 0 : index
    %c0_1 = arith.constant 0 : index
    %3 = vector.load %arg3[%c0, %c0_1] : memref<8x32xbf16, #tpu.memory_space<vmem>>, vector<8x32xbf16>
    %c0_2 = arith.constant 0 : index
    %c0_3 = arith.constant 0 : index
    %4 = vector.load %arg4[%c0_2, %c0_3] : memref<32x128xbf16, #tpu.memory_space<vmem>>, vector<32x128xbf16>
    %cst = arith.constant dense<0.000000e+00> : vector<8x128xf32>
    %5 = tpu.matmul %3, %4, %cst {dimension_numbers = #tpu.dot_dimension_numbers<[1], [0], [0], [1], [0, 0, 1, 1], [], []>} : vector<8x32xbf16>, vector<32x128xbf16>, vector<8x128xf32> -> vector<8x128xf32>
    %c0_4 = arith.constant 0 : index
    %c0_5 = arith.constant 0 : index
    %6 = vector.load %arg5[%c0_4, %c0_5] : memref<1x128xf32, #tpu.memory_space<vmem>>, vector<1x128xf32>
    %7 = vector.broadcast %6 : vector<1x128xf32> to vector<8x128xf32>
    %8 = arith.addf %5, %7 : vector<8x128xf32>
    %c0_6 = arith.constant 0 : index
    %c0_7 = arith.constant 0 : index
    %9 = vector.load %arg8[%c0_6, %c0_7] : memref<8x1xf32, #tpu.memory_space<vmem>>, vector<8x1xf32>
    %cst_8 = arith.constant dense<0xFF800000> : vector<8xf32>
    %10 = vector.multi_reduction <maximumf>, %8, %cst_8 [1] : vector<8x128xf32> to vector<8xf32>
    %11 = vector.shape_cast %10 : vector<8xf32> to vector<8x1xf32>
    %12 = arith.maximumf %9, %11 : vector<8x1xf32>
    %13 = arith.subf %9, %12 : vector<8x1xf32>
    %14 = math.exp %13 : vector<8x1xf32>
    %c0_9 = arith.constant 0 : index
    %c0_10 = arith.constant 0 : index
    %15 = vector.load %arg9[%c0_9, %c0_10] : memref<8x1xf32, #tpu.memory_space<vmem>>, vector<8x1xf32>
    %16 = arith.mulf %14, %15 : vector<8x1xf32>
    %17 = vector.broadcast %12 : vector<8x1xf32> to vector<8x128xf32>
    %18 = arith.subf %8, %17 : vector<8x128xf32>
    %19 = math.exp %18 : vector<8x128xf32>
    %cst_11 = arith.constant dense<0.000000e+00> : vector<8xf32>
    %20 = vector.multi_reduction <add>, %19, %cst_11 [1] : vector<8x128xf32> to vector<8xf32>
    %21 = vector.shape_cast %20 : vector<8xf32> to vector<8x1xf32>
    %22 = arith.addf %16, %21 : vector<8x1xf32>
    %c0_12 = arith.constant 0 : index
    %c0_13 = arith.constant 0 : index
    %23 = vector.load %arg9[%c0_12, %c0_13] : memref<8x1xf32, #tpu.memory_space<vmem>>, vector<8x1xf32>
    tpu.vector_store %arg9[%c0_12, %c0_13], %22 {strides = array<i32>} : memref<8x1xf32, #tpu.memory_space<vmem>>, vector<8x1xf32>,
    %c0_14 = arith.constant 0 : index
    %c0_15 = arith.constant 0 : index
    %24 = vector.load %arg8[%c0_14, %c0_15] : memref<8x1xf32, #tpu.memory_space<vmem>>, vector<8x1xf32>
    tpu.vector_store %arg8[%c0_14, %c0_15], %12 {strides = array<i32>} : memref<8x1xf32, #tpu.memory_space<vmem>>, vector<8x1xf32>,
    %25 = tpu.iota {dimensions = array<i32: 1>} : vector<8x128xi32>
    %c128_i32 = arith.constant 128 : i32
    %26 = arith.muli %arg1, %c128_i32 : i32
    %27 = vector.broadcast %26 : i32 to vector<8x128xi32>
    %28 = arith.addi %25, %27 : vector<8x128xi32>
    %c0_16 = arith.constant 0 : index
    %c0_17 = arith.constant 0 : index
    %29 = vector.load %arg6[%c0_16, %c0_17] : memref<8x1xi32, #tpu.memory_space<vmem>>, vector<8x1xi32>
    %30 = vector.broadcast %29 : vector<8x1xi32> to vector<8x128xi32>
    %31 = arith.cmpi eq, %28, %30 : vector<8x128xi32>
    %c0_18 = arith.constant 0 : index
    %c0_19 = arith.constant 0 : index
    %32 = vector.load %arg10[%c0_18, %c0_19] : memref<8x1xf32, #tpu.memory_space<vmem>>, vector<8x1xf32>
    %cst_20 = arith.constant 0.000000e+00 : f32
    %33 = vector.broadcast %cst_20 : f32 to vector<8x128xf32>
    %34 = arith.select %31, %8, %33 : vector<8x128xi1>, vector<8x128xf32>
    %cst_21 = arith.constant dense<0.000000e+00> : vector<8xf32>
    %35 = vector.multi_reduction <add>, %34, %cst_21 [1] : vector<8x128xf32> to vector<8xf32>
    %36 = vector.shape_cast %35 : vector<8xf32> to vector<8x1xf32>
    %37 = arith.addf %32, %36 : vector<8x1xf32>
    %c0_22 = arith.constant 0 : index
    %c0_23 = arith.constant 0 : index
    %38 = vector.load %arg10[%c0_22, %c0_23] : memref<8x1xf32, #tpu.memory_space<vmem>>, vector<8x1xf32>
    tpu.vector_store %arg10[%c0_22, %c0_23], %37 {strides = array<i32>} : memref<8x1xf32, #tpu.memory_space<vmem>>, vector<8x1xf32>,
    %c0_i32_24 = arith.constant 0 : i32
    %39 = arith.cmpi eq, %arg1, %c0_i32_24 : i32
    %40 = arith.extui %39 : i1 to i32
    %c0_i32_25 = arith.constant 0 : i32
    %41 = arith.cmpi ne, %40, %c0_i32_25 : i32
    scf.if %41 {
      %c0_26 = arith.constant 0 : index
      %c0_27 = arith.constant 0 : index
      %42 = vector.load %arg8[%c0_26, %c0_27] : memref<8x1xf32, #tpu.memory_space<vmem>>, vector<8x1xf32>
      %c0_28 = arith.constant 0 : index
      %c0_29 = arith.constant 0 : index
      %43 = vector.load %arg9[%c0_28, %c0_29] : memref<8x1xf32, #tpu.memory_space<vmem>>, vector<8x1xf32>
      %44 = math.log %43 : vector<8x1xf32>
      %45 = arith.addf %42, %44 : vector<8x1xf32>
      %c0_30 = arith.constant 0 : index
      %c0_31 = arith.constant 0 : index
      %46 = vector.load %arg10[%c0_30, %c0_31] : memref<8x1xf32, #tpu.memory_space<vmem>>, vector<8x1xf32>
      %47 = arith.subf %45, %46 : vector<8x1xf32>
      %48 = tpu.iota {dimensions = array<i32: 0>} : vector<8x1xi32>
      %c8_i32 = arith.constant 8 : i32
      %49 = arith.muli %arg0, %c8_i32 : i32
      %50 = vector.broadcast %49 : i32 to vector<8x1xi32>
      %51 = arith.addi %48, %50 : vector<8x1xi32>
      %c0_32 = arith.constant 0 : index
      %52 = memref.load %arg2[%c0_32] : memref<1xi32, #tpu.memory_space<smem>>
      %53 = vector.broadcast %52 : i32 to vector<8x1xi32>
      %54 = arith.cmpi slt, %51, %53 : vector<8x1xi32>
      %cst_33 = arith.constant 0.000000e+00 : f32
      %55 = vector.broadcast %cst_33 : f32 to vector<8x1xf32>
      %56 = arith.select %54, %47, %55 : vector<8x1xi1>, vector<8x1xf32>
      %57 = vector.shape_cast %56 : vector<8x1xf32> to vector<1x8x1xf32>
      %cst_34 = arith.constant dense<0.000000e+00> : vector<1xf32>
      %58 = vector.multi_reduction <add>, %57, %cst_34 [1, 2] : vector<1x8x1xf32> to vector<1xf32>
      %59 = vector.shape_cast %58 : vector<1xf32> to vector<1x1x1xf32>
      %60 = vector.extract %59[0, 0, 0] : f32 from vector<1x1x1xf32>
      %61 = tpu.iota {dimensions = array<i32: 1>} : vector<1x128xi32>
      %c0_i32_35 = arith.constant 0 : i32
      %62 = vector.broadcast %c0_i32_35 : i32 to vector<1x128xi32>
      %63 = arith.cmpi eq, %61, %62 : vector<1x128xi32>
      %cst_36 = arith.constant 0.000000e+00 : f32
      %64 = vector.broadcast %60 : f32 to vector<1x128xf32>
      %65 = vector.broadcast %cst_36 : f32 to vector<1x128xf32>
      %66 = arith.select %63, %64, %65 : vector<1x128xi1>, vector<1x128xf32>
      %c0_37 = arith.constant 0 : index
      %c0_38 = arith.constant 0 : index
      %67 = vector.load %arg7[%c0_37, %c0_38] : memref<1x128xf32, #tpu.memory_space<vmem>>, vector<1x128xf32>
      tpu.vector_store %arg7[%c0_37, %c0_38], %66 {strides = array<i32>} : memref<1x128xf32, #tpu.memory_space<vmem>>, vector<1x128xf32>,
    } else {
    }
    return
  }
  func.func @transform_0(%arg0: i32, %arg1: i32, %arg2: memref<1xi32, #tpu.memory_space<smem>>) -> (i32, i32) {
    %c0_i32 = arith.constant 0 : i32
    %c0_i32_0 = arith.constant 0 : i32
    return %arg0, %c0_i32 : i32, i32
  }
  func.func @transform_1(%arg0: i32, %arg1: i32, %arg2: memref<1xi32, #tpu.memory_space<smem>>) -> (i32, i32) {
    %c0_i32 = arith.constant 0 : i32
    %c0_i32_0 = arith.constant 0 : i32
    return %c0_i32, %arg1 : i32, i32
  }
  func.func @transform_2(%arg0: i32, %arg1: i32, %arg2: memref<1xi32, #tpu.memory_space<smem>>) -> (i32, i32) {
    %c0_i32 = arith.constant 0 : i32
    %c0_i32_0 = arith.constant 0 : i32
    return %c0_i32, %arg1 : i32, i32
  }
  func.func @transform_3(%arg0: i32, %arg1: i32, %arg2: memref<1xi32, #tpu.memory_space<smem>>) -> (i32, i32) {
    %c0_i32 = arith.constant 0 : i32
    %c0_i32_0 = arith.constant 0 : i32
    return %arg0, %c0_i32 : i32, i32
  }
  func.func @transform_4(%arg0: i32, %arg1: i32, %arg2: memref<1xi32, #tpu.memory_space<smem>>) -> (i32, i32) {
    %c0_i32 = arith.constant 0 : i32
    %c0_i32_0 = arith.constant 0 : i32
    return %arg0, %c0_i32 : i32, i32
  }
}

</mosaic_0001>

<bundles_post_ra>
// kernel: tpu_custom_call.1
= control target key start
LH: loop header
LB: loop body
LE: loop exit
PB: predicated region body
PF: predicated region fallthrough
CT: control target
= control target key end

     0   :  { %11 = vsyncpa [#allocation8], 0  ;;  %s340_s0 = inlined_call_operand.<no memory space> [shape: s32[1], index: 0, kind: input, shape index: {}]   ;;  %s341_s1 = inlined_call_operand.vmem [shape: bf16[8,32], index: 1, kind: input, shape index: {}]   ;;  %s342_s2 = inlined_call_operand.hbm [shape: bf16[32,128], index: 2, kind: input, shape index: {}]   ;;  %s343_s3 = inlined_call_operand.vmem [shape: f32[1,128], index: 3, kind: input, shape index: {}]   ;;  %s344_s4 = inlined_call_operand.vmem [shape: s32[8,1], index: 4, kind: input, shape index: {}]   ;;  %s345_s5 = inlined_call_operand.hbm [shape: f32[1,128], index: 5, kind: output, shape index: {}]  }
   0x1   :  { %12 = vsyncpa [#allocation9], 0  ;;  %s277_s18 = smov [#allocation7]  }
   0x2   :  { %s20_s19 = sshll.u32 %s277_s18, 4  ;;  %s21_s19 = int_to_ptr.vmem [resolvable:$true] %s20_s19 }
   0x3   :  { %s241_s20 = scalar_lea.vmem %s21_s19, 256  ;;  %p246_p1 = scmp.lt.s32.totalorder %s21_s19, %s21_s19 }
   0x4   :  { %p242_p0 = scmp.ne.s32.totalorder %s21_s19, %s241_s20  ;;  %p247_p2 = scmp.lt.s32.totalorder %s241_s20, %s241_s20 }
   0x6   :  { %p248_p3 = por %p247_p2, %p246_p1 }
   0x8   :  { %p249_p4 = pnand %p248_p3, %p242_p0 }
   0xa   :  { %252 = shalt.err (!%p249_p4)
}
   0xb   :  { %s278_s21 = smov 64   ;;  %s279_s22 = smov 4  }
   0xc   :  { %26 = dma.hbm_to_vmem [thread:$0]  %s342_s2, 256, %s21_s19, [#allocation8], %s278_s21, %s278_s21, %s279_s22  }
   0xd   :  { %273 = dma.done.wait [#allocation8], 256  }
   0xe   :  { %274 = vsyncadd [#allocation8], 4294967040  ;;  %vm39_vm0 = vcmask 7168   ;;  %v280_v0 = vmov 0.0   ;;  %vm281_vm1 = vmmov 0   ;;  %v282_v1 = vmov 0  }
   0xf   :  { %41 = vst.msk [vmem:[#allocation3] sm:$0xff] %vm39_vm0, %v280_v0  ;;  %42 = vst.msk [vmem:[#allocation4] sm:$0xff] %vm39_vm0, %v280_v0  ;;  %205 = vmatprep.subr.bf16.mxu0 %v280_v0  ;;  %209 = vmatprep.mubr.msk.bf16.mxu0 %vm281_vm1, %v280_v0  ;;  %v225_v2 = vld [vmem:[#allocation7 + $0x8] sm:$0xff]   ;;  %v226_v3 = vld [vmem:[#allocation7] sm:$0xff]   ;;  %vm67_vm2 = vcmask 261120   ;;  %v283_v6 = vmov -inf   ;;  %v134_v20 = vlaneseq  ;;  %v166_v38 = vstv %s340_s0 }
  0x10   :  { %224 = vset.pattern.permute.xlu1 %v282_v1  ;;  %223 = vset.pattern.permute.xlu0 %v282_v1  ;;  %v139_v4 = vld [vmem:[%s344_s4] sm:$0xff]  ;;  %40 = vst.msk [vmem:[#allocation2] sm:$0xff] %vm39_vm0, %v283_v6  ;;  %s284_s4 = smov [#allocation10]  }
  0x11   :  { %206 = vmatpush3.bf16.msra.mxu0 %v225_v2  ;;  %141 = vperm.xlu1 %224, %v139_v4   ;;  %v43_v5 = vld [vmem:[%s341_s1] sm:$0xf]  ;;  %v135_v21 = vand.u32 127, %v134_v20  ;;  %v161_v36 = vshrl.u32 %v134_v20, 7  ;;  %s189_s30 = sshll.u32 %s284_s4, 4  ;;  %s190_s30 = int_to_ptr.vmem [resolvable:$true] %s189_s30 }
  0x12   :  { %207 = vmatprep.subr.bf16.mxu0 %v280_v0  ;;  %v198_v7 = vld [vmem:[%s343_s3] ss:$0 sm:$0xff]  ;;  %s253_s6 = scalar_lea.vmem %s190_s30, 16  ;;  %s257_s7 = scalar_lea.vmem %s190_s30, 32 }
  0x13   :  { %vm167_vm4 = vcmp.lt.s32.totalorder %v161_v36, %v166_v38  ;;  %vm179_vm5 = vcmp.eq.s32.totalorder %v135_v21, 0  ;;  %p254_p5 = scmp.ne.s32.totalorder %s190_s30, %s253_s6  ;;  %p258_p6 = scmp.lt.s32.totalorder %s190_s30, %s190_s30 }
  0x14   :  { %p259_p7 = scmp.lt.s32.totalorder %s257_s7, %s253_s6 }
  0x15   :  { %208 = vmatpush3.bf16.msra.mxu0 %v226_v3 }
  0x16   :  { %v118_v27 = vld [vmem:[#allocation3] sm:$0xff]  ;;  %v144_v31 = vld [vmem:[#allocation4] sm:$0xff]  ;;  %p260_p8 = por %p259_p7, %p258_p6 }
  0x17   :  { %v111_v13 = vld [vmem:[#allocation2] sm:$0xff] }
  0x18   :  { %210 = vmatmul.mubr.msk.bf16.vlgmr.msra.gmra.mxu0 %vm67_vm2, %v43_v5  ;;  %p261_p9 = pnand %p260_p8, %p254_p5 }
  0x8c   :  { %v142_v22 = vpop.permute.xlu1 %141 }
  0x8d   :  { %vm143_vm3 = vcmp.eq.s32.totalorder %v135_v21, %v142_v22 }
  0xd8   :  { %v105_v8 = vpop.f32.mrf.mxu0 }
  0xd9   :  { %v106_v9 = vadd.f32 %v198_v7, %v105_v8 }
  0xda   :  { %v211_v10 = vpop.f32.mrf.mxu0 }
  0xdb   :  { %112 = vmax.xlane.f32.xlu0 %v106_v9  ;;  %v145_v24 = vsel %vm143_vm3, %v106_v9, 0.0 }
  0xdc   :  { %v108_v11 = vpop.f32.mrf.mxu0 }
  0xde   :  { %v212_v12 = vpop.f32.mrf.mxu0 }
 0x164   :  { %v113_v14 = vpop.xlane.xlu0 %112 }
 0x165   :  { %v114_v15 = vmax.f32 %v111_v13, %v113_v14 }
 0x167   :  { %v115_v16 = vsub.f32 %v111_v13, %v114_v15  ;;  %133 = vst.msk [vmem:[#allocation2] sm:$0xff] %vm39_vm0, %v114_v15  ;;  %122 = vperm.xlu0 %223, %v114_v15  }
 0x169   :  { %v116_v25 = vmul.f32 1.442695, %v115_v16 }
 0x16e   :  { %v153_v39 = vld [vmem:[#allocation2] sm:$0xff] }
 0x1e2   :  { %v123_v17 = vpop.permute.xlu0 %122 }
 0x1e3   :  { %v125_v18 = vsub.f32 %v106_v9, %v123_v17 }
 0x1e5   :  { %v126_v19 = vmul.f32 1.442695, %v125_v18 }
 0x1e7   :  { %227 = vpow2.f32 %v126_v19 }
 0x1e8   :  { %229 = vpow2.f32 %v116_v25 }
 0x1f4   :  { %v228_v23 = vpop.eup %227 }
 0x1f5   :  { %128 = vadd.xlane.f32.xlu1 %v228_v23  ;;  %v230_v26 = vpop.eup %229 }
 0x1f6   :  { %v119_v28 = vmul.f32 %v230_v26, %v118_v27 }
 0x1f9   :  { %146 = vadd.xlane.f32.xlu1 %v145_v24 }
 0x27e   :  { %v129_v29 = vpop.xlane.xlu1 %128 }
 0x27f   :  { %v130_v30 = vadd.f32 %v129_v29, %v119_v28 }
 0x281   :  { %132 = vst.msk [vmem:[#allocation3] sm:$0xff] %vm39_vm0, %v130_v30 }
 0x282   :  { %v147_v32 = vpop.xlane.xlu1 %146 }
 0x283   :  { %v148_v33 = vadd.f32 %v147_v32, %v144_v31 }
 0x285   :  { %149 = vst.msk [vmem:[#allocation4] sm:$0xff] %vm39_vm0, %v148_v33 }
 0x288   :  { %v154_v34 = vld [vmem:[#allocation3] sm:$0xff] }
 0x289   :  { %231 = vlog2.f32 %v154_v34 }
 0x28c   :  { %v158_v41 = vld [vmem:[#allocation4] sm:$0xff] }
 0x296   :  { %v232_v35 = vpop.eup %231 }
 0x297   :  { %v156_v37 = vmul.f32 0.6931472, %v232_v35 }
 0x299   :  { %v157_v40 = vadd.f32 %v156_v37, %v153_v39 }
 0x29b   :  { %v159_v42 = vsub.f32 %v157_v40, %v158_v41 }
 0x29d   :  { %v168_v43 = vsel %vm167_vm4, %v159_v42, 0.0 }
 0x29e   :  { %v169_v44 = vsel %vm39_vm0, %v168_v43, 0.0 }
 0x29f   :  { %170 = vadd.xlane.f32.xlu1 %v169_v44 }
 0x328   :  { %v171_v45 = vpop.xlane.xlu1 %170 }
 0x329   :  { %v172_v46 = vrot.slane %v171_v45, 4 }
 0x32b   :  { %v173_v47 = vadd.f32 %v172_v46, %v171_v45 }
 0x32d   :  { %v174_v48 = vrot.slane %v173_v47, 2 }
 0x32f   :  { %v175_v49 = vadd.f32 %v174_v48, %v173_v47 }
 0x331   :  { %v176_v50 = vrot.slane %v175_v49, 1 }
 0x333   :  { %v177_v51 = vadd.f32 %v176_v50, %v175_v49 }
 0x335   :  { %213 = vpush %v177_v51 }
 0x366   :  { %s214_s0 = spop %213 }
 0x367   :  { %v180_v52 = vstv %s214_s0 }
 0x368   :  { %v181_v53 = vsel %vm179_vm5, %v180_v52, 0.0 }
 0x369   :  { %182 = vst [vmem:[#allocation10] sm:$0x1] %v181_v53 }
 0x36a   :  { %264 = shalt.err (!%p261_p9)
}
 0x36b   :  { %192 = dma.vmem_to_hbm [thread:$0]  %s190_s30, 16, %s345_s5, [#allocation9]  }
 0x36c   :  { %275 = dma.done.wait [#allocation9], 16  }
 0x36d   :  { %276 = vsyncadd [#allocation9], 4294967280 }
 0x36e   :  { %196 = vsyncpa [#allocation8], 1 }
 0x36f   :  { %197 = vsyncpa [#allocation9], 1 }

</bundles_post_ra>
